<compile_context>
chip_gen: v6e
topology: v6e:2x2x1
jax: 0.10.0
libtpu: 0.0.40
codegen_flags: <defaults>
</compile_context>

<pallas_src>
import jax
import jax.numpy as jnp
import numpy as np
from jax.experimental import pallas as pl
from jax.experimental.pallas import tpu as pltpu

EPS = 1e-3  # BatchNorm2d(eps=0.001)


def conv_pool_stats_kernel(p_ref, w_ref, yc_ref, yp_ref, sc_ref, sp_ref):
    """p_ref : (9*Cin, rt)  bf16 im2col patches (taps major, channel minor; output pixels on lanes)
       w_ref : (Cconv, 9*Cin) bf16 conv weights
       yc_ref: (Cconv, rt) bf16 pre-BN conv activations
       yp_ref: (Cin,  rt) bf16 pre-BN maxpool activations
       sc_ref: (1, Cconv, 2) f32 per-tile [sum, sum_sq] for the conv branch
       sp_ref: (1, Cin,  2) f32 per-tile [sum, sum_sq] for the pool branch"""
    cin = p_ref.shape[0] // 9
    p = p_ref[...]                                                     # bf16 (9*Cin, rt)

    # Conv branch: bf16 operands, f32 accumulation on the MXU.
    conv = jnp.dot(w_ref[...], p, preferred_element_type=jnp.float32)  # (Cconv, rt) f32

    # MaxPool branch: the 2x2 pool window == conv taps (1,1),(1,2),(2,1),(2,2) of the same patches.
    # Upcast each tap to f32 before the max (v5e has no bf16 VALU).
    t11 = p[4 * cin:5 * cin, :].astype(jnp.float32)
    t12 = p[5 * cin:6 * cin, :].astype(jnp.float32)
    t21 = p[7 * cin:8 * cin, :].astype(jnp.float32)
    t22 = p[8 * cin:9 * cin, :].astype(jnp.float32)
    pool = jnp.maximum(jnp.maximum(t11, t12), jnp.maximum(t21, t22))   # (Cin, rt) f32

    # Fused single-pass partial BN statistics, computed in f32 before the bf16 downcast.
    sc_ref[0] = jnp.concatenate([jnp.sum(conv, axis=1, keepdims=True),
                                 jnp.sum(conv * conv, axis=1, keepdims=True)], axis=1)
    sp_ref[0] = jnp.concatenate([jnp.sum(pool, axis=1, keepdims=True),
                                 jnp.sum(pool * pool, axis=1, keepdims=True)], axis=1)

    yc_ref[...] = conv.astype(yc_ref.dtype)
    yp_ref[...] = pool.astype(yp_ref.dtype)


def _pick_rows_tile(rows, cin, cout, requested=None):
    """Multiple of 128, as large as useful (target 1024), clamped so the double-buffered bf16
    streams stay well inside the scoped-VMEM default on every TPU generation."""
    rows128 = ((rows + 127) // 128) * 128
    if requested is not None:
        rt = ((int(requested) + 127) // 128) * 128
    else:
        vmem_budget = 12 * 1024 * 1024            # conservative: v5e scoped default is 16 MiB
        bytes_per_row = 2 * 2 * (9 * cin + cout)  # double-buffered bf16 input + output streams
        rt = min(1024, max(128, (vmem_budget // bytes_per_row) // 128 * 128))
    rt = max(128, min(rt, rows128))               # don't pad tiny problems up to a huge tile
    return rt


def downsampler_block(x_nchw, w_conv, bias, gamma, beta, *, rows_tile=None):
    """x_nchw: (N, Cin, H, W); w_conv: (Cout-Cin, Cin, 3, 3) PyTorch Conv2d weight (OIHW);
       bias: (Cout-Cin,) conv bias (ignored: cancels exactly in batch-statistic BN);
       gamma/beta: (Cout,) BN affine. Returns (N, Cout, H//2, W//2) f32."""
    del bias  # per-channel constant before batch-statistic BatchNorm is a forward-pass no-op
    N, Cin, H, W = x_nchw.shape
    assert H % 2 == 0 and W % 2 == 0, "even spatial dims assumed (conv s=2 p=1 and pool 2x2 agree)"
    Cconv = w_conv.shape[0]
    Cout = Cconv + Cin
    Ho, Wo = H // 2, W // 2
    rows = N * Ho * Wo
    rt = _pick_rows_tile(rows, Cin, Cout, rows_tile)
    rows_pad = ((rows + rt - 1) // rt) * rt
    grid = rows_pad // rt

    # --- glue: bf16 transposed im2col (9*Cin, rows); rows = flattened (N, Ho, Wo) on lanes
    x = jnp.transpose(x_nchw, (0, 2, 3, 1)).astype(jnp.bfloat16)       # NHWC, bf16 (halves traffic)
    xpad = jnp.pad(x, ((0, 0), (1, 1), (1, 1), (0, 0)))                # zero padding = PyTorch p=1
    taps = [xpad[:, ky:ky + 2 * Ho:2, kx:kx + 2 * Wo:2, :]             # (N, Ho, Wo, Cin) per tap
            for ky in range(3) for kx in range(3)]
    patches_t = jnp.transpose(jnp.stack(taps, axis=0),
                              (0, 4, 1, 2, 3)).reshape(9 * Cin, rows)
    # zero row padding is exactly neutral for the statistics (no conv bias, maxpool(0)=0)
    patches_t = jnp.pad(patches_t, ((0, 0), (0, rows_pad - rows)))

    # conv weight -> (Cconv, 9*Cin), tap-major / channel-minor, bf16 for the MXU
    w_mat = jnp.transpose(w_conv, (0, 2, 3, 1)).reshape(Cconv, 9 * Cin).astype(jnp.bfloat16)

    # --- single pallas pass: conv + maxpool + per-tile BN partials (lane-dense outputs)
    y_conv, y_pool, st_conv, st_pool = pl.pallas_call(
        conv_pool_stats_kernel,
        grid=(grid,),
        out_shape=(jax.ShapeDtypeStruct((Cconv, rows_pad), jnp.bfloat16),
                   jax.ShapeDtypeStruct((Cin, rows_pad), jnp.bfloat16),
                   jax.ShapeDtypeStruct((grid, Cconv, 2), jnp.float32),
                   jax.ShapeDtypeStruct((grid, Cin, 2), jnp.float32)),
        in_specs=[pl.BlockSpec((9 * Cin, rt), lambda r: (0, r)),
                  pl.BlockSpec((Cconv, 9 * Cin), lambda r: (0, 0))],
        out_specs=(pl.BlockSpec((Cconv, rt), lambda r: (0, r)),
                   pl.BlockSpec((Cin, rt), lambda r: (0, r)),
                   pl.BlockSpec((1, Cconv, 2), lambda r: (r, 0, 0)),
                   pl.BlockSpec((1, Cin, 2), lambda r: (r, 0, 0))),
        compiler_params=pltpu.CompilerParams(dimension_semantics=("parallel",)),
    )(patches_t, w_mat)

    # --- fold batch stats into per-channel scale/shift (tiny, O(Cout))
    totals = jnp.concatenate([jnp.sum(st_conv, axis=0), jnp.sum(st_pool, axis=0)], axis=0)  # (Cout,2)
    mean = totals[:, 0] / rows
    var = jnp.maximum(totals[:, 1] / rows - mean * mean, 0.0)          # biased var, as in BN
    scale = gamma.astype(jnp.float32) * jax.lax.rsqrt(var + EPS)       # (Cout,)
    shift = beta.astype(jnp.float32) - mean * scale

    # --- epilogue (affine + ReLU) in plain jnp: XLA fuses it with the slice/reshape/transpose back
    #     to NCHW, so the output tensor is read once and written once (no extra pallas round-trip).
    def _finish(y, sc, sh, c):
        y = y[:, :rows].astype(jnp.float32).reshape(c, N, Ho, Wo)
        y = jnp.maximum(y * sc.reshape(c, 1, 1, 1) + sh.reshape(c, 1, 1, 1), 0.0)
        return jnp.transpose(y, (1, 0, 2, 3))                          # (N, c, Ho, Wo)

    out_conv = _finish(y_conv, scale[:Cconv], shift[:Cconv], Cconv)
    out_pool = _finish(y_pool, scale[Cconv:], shift[Cconv:], Cin)
    return jnp.concatenate([out_conv, out_pool], axis=1)               # (N, Cout, Ho, Wo)


def reference(x_nchw, w_conv, bias, gamma, beta):
    """Pure-JAX f32 reference matching the PyTorch module (training-mode BN, batch stats)."""
    N, Cin, H, W = x_nchw.shape
    Cconv = w_conv.shape[0]
    x = x_nchw.astype(jnp.float32)
    conv = jax.lax.conv_general_dilated(
        x, w_conv.astype(jnp.float32), window_strides=(2, 2), padding=((1, 1), (1, 1)),
        dimension_numbers=('NCHW', 'OIHW', 'NCHW'),
        precision=jax.lax.Precision.HIGHEST) + bias.reshape(1, Cconv, 1, 1)
    pool = jax.lax.reduce_window(x, -jnp.inf, jax.lax.max,
                                 (1, 1, 2, 2), (1, 1, 2, 2), 'VALID')
    y = jnp.concatenate([conv, pool], axis=1)
    mean = jnp.mean(y, axis=(0, 2, 3), keepdims=True)
    var = jnp.mean(jnp.square(y - mean), axis=(0, 2, 3), keepdims=True)
    y = (y - mean) / jnp.sqrt(var + EPS) * gamma.reshape(1, -1, 1, 1) + beta.reshape(1, -1, 1, 1)
    return jnp.maximum(y, 0.0)


if __name__ == "__main__":
    # DownsamplerBlock(ninput=4, noutput=16) on (2, 4, 32, 32) -> rows = 512 (one 512-lane tile).
    N, Cin, Cout, H, W = 2, 4, 16, 32, 32
    Cconv = Cout - Cin

    key = jax.random.PRNGKey(0)
    k1, k2, k3, k4, k5 = jax.random.split(key, 5)
    x = jax.random.normal(k1, (N, Cin, H, W), jnp.float32)
    w_conv = 0.2 * jax.random.normal(k2, (Cconv, Cin, 3, 3), jnp.float32)   # Conv2d weight (OIHW)
    bias = 0.1 * jax.random.normal(k3, (Cconv,), jnp.float32)               # Conv2d bias
    gamma = 1.0 + 0.1 * jax.random.normal(k4, (Cout,), jnp.float32)         # BN weight
    beta = 0.1 * jax.random.normal(k5, (Cout,), jnp.float32)                # BN bias

    out = jax.block_until_ready(downsampler_block(x, w_conv, bias, gamma, beta))
    assert out.shape == (N, Cout, H // 2, W // 2), out.shape
    ref = jax.block_until_ready(reference(x, w_conv, bias, gamma, beta))
    # bf16 patches / bf16 MXU operands / bf16 pre-BN store vs full-f32 reference -> loose tolerance.
    np.testing.assert_allclose(np.asarray(out), np.asarray(ref), rtol=3e-2, atol=3e-2)

    # Also exercise the multi-tile + zero-row-padding path: H=28, W=20 -> rows=280, rt=128, grid=3.
    x2 = x[:, :, :28, :20]
    out2 = jax.block_until_ready(downsampler_block(x2, w_conv, bias, gamma, beta, rows_tile=128))
    ref2 = jax.block_until_ready(reference(x2, w_conv, bias, gamma, beta))
    np.testing.assert_allclose(np.asarray(out2), np.asarray(ref2), rtol=3e-2, atol=3e-2)

    print("KERNEL_OK")
</pallas_src>

<mosaic_0001>
module attributes {stable_mosaic.version = 11 : i64} {
  func.func @conv_pool_stats_kernel(%arg0: i32, %arg1: memref<36x512xbf16, #tpu.memory_space<vmem>>, %arg2: memref<12x36xbf16, #tpu.memory_space<vmem>>, %arg3: memref<12x512xbf16, #tpu.memory_space<vmem>>, %arg4: memref<4x512xbf16, #tpu.memory_space<vmem>>, %arg5: memref<1x12x2xf32, #tpu.memory_space<vmem>>, %arg6: memref<1x4x2xf32, #tpu.memory_space<vmem>>) attributes {dimension_semantics = [#tpu.dimension_semantics<parallel>], iteration_bounds = array<i64: 1>, scalar_prefetch = 0 : i64, scratch_operands = 0 : i64, tpu.core_type = #tpu.core_type<tc>, window_params = [{transform_indices = @transform_0, window_bounds = array<i64: 36, 512>}, {pipeline_mode = #tpu.pipeline_mode<synchronous>, transform_indices = @transform_1, window_bounds = array<i64: 12, 36>}, {transform_indices = @transform_2, window_bounds = array<i64: 12, 512>}, {transform_indices = @transform_3, window_bounds = array<i64: 4, 512>}, {transform_indices = @transform_4, window_bounds = array<i64: 1, 12, 2>}, {transform_indices = @transform_5, window_bounds = array<i64: 1, 4, 2>}]} {
    %c0 = arith.constant 0 : index
    %c0_0 = arith.constant 0 : index
    %0 = vector.load %arg1[%c0, %c0_0] : memref<36x512xbf16, #tpu.memory_space<vmem>>, vector<36x512xbf16>
    %c0_1 = arith.constant 0 : index
    %c0_2 = arith.constant 0 : index
    %1 = vector.load %arg2[%c0_1, %c0_2] : memref<12x36xbf16, #tpu.memory_space<vmem>>, vector<12x36xbf16>
    %cst = arith.constant dense<0.000000e+00> : vector<12x512xf32>
    %2 = tpu.matmul %1, %0, %cst {dimension_numbers = #tpu.dot_dimension_numbers<[1], [0], [0], [1], [0, 0, 1, 1], [], []>} : vector<12x36xbf16>, vector<36x512xbf16>, vector<12x512xf32> -> vector<12x512xf32>
    %3 = vector.extract_strided_slice %0 {offsets = [16, 0], sizes = [4, 512], strides = [1, 1]} : vector<36x512xbf16> to vector<4x512xbf16>
    %4 = arith.extf %3 : vector<4x512xbf16> to vector<4x512xf32>
    %5 = vector.extract_strided_slice %0 {offsets = [20, 0], sizes = [4, 512], strides = [1, 1]} : vector<36x512xbf16> to vector<4x512xbf16>
    %6 = arith.extf %5 : vector<4x512xbf16> to vector<4x512xf32>
    %7 = vector.extract_strided_slice %0 {offsets = [28, 0], sizes = [4, 512], strides = [1, 1]} : vector<36x512xbf16> to vector<4x512xbf16>
    %8 = arith.extf %7 : vector<4x512xbf16> to vector<4x512xf32>
    %9 = vector.extract_strided_slice %0 {offsets = [32, 0], sizes = [4, 512], strides = [1, 1]} : vector<36x512xbf16> to vector<4x512xbf16>
    %10 = arith.extf %9 : vector<4x512xbf16> to vector<4x512xf32>
    %11 = arith.maximumf %4, %6 : vector<4x512xf32>
    %12 = arith.maximumf %8, %10 : vector<4x512xf32>
    %13 = arith.maximumf %11, %12 : vector<4x512xf32>
    %cst_3 = arith.constant dense<0.000000e+00> : vector<12xf32>
    %14 = vector.multi_reduction <add>, %2, %cst_3 [1] : vector<12x512xf32> to vector<12xf32>
    %15 = vector.shape_cast %14 : vector<12xf32> to vector<12x1xf32>
    %16 = arith.mulf %2, %2 : vector<12x512xf32>
    %cst_4 = arith.constant dense<0.000000e+00> : vector<12xf32>
    %17 = vector.multi_reduction <add>, %16, %cst_4 [1] : vector<12x512xf32> to vector<12xf32>
    %18 = vector.shape_cast %17 : vector<12xf32> to vector<12x1xf32>
    %19 = tpu.concatenate %15, %18 in 1 : vector<12x1xf32>, vector<12x1xf32> -> vector<12x2xf32>
    %c0_5 = arith.constant 0 : index
    %c0_6 = arith.constant 0 : index
    %c0_7 = arith.constant 0 : index
    %20 = vector.load %arg5[%c0_5, %c0_6, %c0_7] : memref<1x12x2xf32, #tpu.memory_space<vmem>>, vector<1x12x2xf32>
    %21 = vector.shape_cast %20 : vector<1x12x2xf32> to vector<12x2xf32>
    %22 = vector.shape_cast %19 : vector<12x2xf32> to vector<1x12x2xf32>
    tpu.vector_store %arg5[%c0_5, %c0_6, %c0_7], %22 {strides = array<i32>} : memref<1x12x2xf32, #tpu.memory_space<vmem>>, vector<1x12x2xf32>,
    %cst_8 = arith.constant dense<0.000000e+00> : vector<4xf32>
    %23 = vector.multi_reduction <add>, %13, %cst_8 [1] : vector<4x512xf32> to vector<4xf32>
    %24 = vector.shape_cast %23 : vector<4xf32> to vector<4x1xf32>
    %25 = arith.mulf %13, %13 : vector<4x512xf32>
    %cst_9 = arith.constant dense<0.000000e+00> : vector<4xf32>
    %26 = vector.multi_reduction <add>, %25, %cst_9 [1] : vector<4x512xf32> to vector<4xf32>
    %27 = vector.shape_cast %26 : vector<4xf32> to vector<4x1xf32>
    %28 = tpu.concatenate %24, %27 in 1 : vector<4x1xf32>, vector<4x1xf32> -> vector<4x2xf32>
    %c0_10 = arith.constant 0 : index
    %c0_11 = arith.constant 0 : index
    %c0_12 = arith.constant 0 : index
    %29 = vector.load %arg6[%c0_10, %c0_11, %c0_12] : memref<1x4x2xf32, #tpu.memory_space<vmem>>, vector<1x4x2xf32>
    %30 = vector.shape_cast %29 : vector<1x4x2xf32> to vector<4x2xf32>
    %31 = vector.shape_cast %28 : vector<4x2xf32> to vector<1x4x2xf32>
    tpu.vector_store %arg6[%c0_10, %c0_11, %c0_12], %31 {strides = array<i32>} : memref<1x4x2xf32, #tpu.memory_space<vmem>>, vector<1x4x2xf32>,
    %32 = arith.truncf %2 : vector<12x512xf32> to vector<12x512xbf16>
    %c0_13 = arith.constant 0 : index
    %c0_14 = arith.constant 0 : index
    %33 = vector.load %arg3[%c0_13, %c0_14] : memref<12x512xbf16, #tpu.memory_space<vmem>>, vector<12x512xbf16>
    tpu.vector_store %arg3[%c0_13, %c0_14], %32 {strides = array<i32>} : memref<12x512xbf16, #tpu.memory_space<vmem>>, vector<12x512xbf16>,
    %34 = arith.truncf %13 : vector<4x512xf32> to vector<4x512xbf16>
    %c0_15 = arith.constant 0 : index
    %c0_16 = arith.constant 0 : index
    %35 = vector.load %arg4[%c0_15, %c0_16] : memref<4x512xbf16, #tpu.memory_space<vmem>>, vector<4x512xbf16>
    tpu.vector_store %arg4[%c0_15, %c0_16], %34 {strides = array<i32>} : memref<4x512xbf16, #tpu.memory_space<vmem>>, vector<4x512xbf16>,
    return
  }
  func.func @transform_0(%arg0: i32) -> (i32, i32) {
    %c0_i32 = arith.constant 0 : i32
    %c0_i32_0 = arith.constant 0 : i32
    return %c0_i32, %arg0 : i32, i32
  }
  func.func @transform_1(%arg0: i32) -> (i32, i32) {
    %c0_i32 = arith.constant 0 : i32
    %c0_i32_0 = arith.constant 0 : i32
    %c0_i32_1 = arith.constant 0 : i32
    return %c0_i32, %c0_i32_0 : i32, i32
  }
  func.func @transform_2(%arg0: i32) -> (i32, i32) {
    %c0_i32 = arith.constant 0 : i32
    %c0_i32_0 = arith.constant 0 : i32
    return %c0_i32, %arg0 : i32, i32
  }
  func.func @transform_3(%arg0: i32) -> (i32, i32) {
    %c0_i32 = arith.constant 0 : i32
    %c0_i32_0 = arith.constant 0 : i32
    return %c0_i32, %arg0 : i32, i32
  }
  func.func @transform_4(%arg0: i32) -> (i32, i32, i32) {
    %c0_i32 = arith.constant 0 : i32
    %c0_i32_0 = arith.constant 0 : i32
    %c0_i32_1 = arith.constant 0 : i32
    return %arg0, %c0_i32, %c0_i32_0 : i32, i32, i32
  }
  func.func @transform_5(%arg0: i32) -> (i32, i32, i32) {
    %c0_i32 = arith.constant 0 : i32
    %c0_i32_0 = arith.constant 0 : i32
    %c0_i32_1 = arith.constant 0 : i32
    return %arg0, %c0_i32, %c0_i32_0 : i32, i32, i32
  }
}

</mosaic_0001>

<bundles_post_ra>
// kernel: tpu_custom_call.1
= control target key start
LH: loop header
LB: loop body
LE: loop exit
PB: predicated region body
PF: predicated region fallthrough
CT: control target
= control target key end

     0   :  { %11 = vsyncpa [#allocation3], 0  ;;  %s690_s0 = inlined_call_operand.hbm [shape: bf16[36,512], index: 0, kind: input, shape index: {}]   ;;  %s691_s1 = inlined_call_operand.hbm [shape: bf16[12,36], index: 1, kind: input, shape index: {}]   ;;  %s692_s2 = inlined_call_operand.hbm [shape: bf16[12,512], index: 2, kind: output, shape index: {0}]   ;;  %s693_s3 = inlined_call_operand.hbm [shape: bf16[4,512], index: 3, kind: output, shape index: {1}]   ;;  %s694_s4 = inlined_call_operand.vmem [shape: f32[1,12,2], index: 4, kind: output, shape index: {2}]   ;;  %s695_s5 = inlined_call_operand.vmem [shape: f32[1,4,2], index: 5, kind: output, shape index: {3}]  }
   0x1   :  { %12 = vsyncpa [#allocation6], 0 }
   0x2   :  { %13 = vsyncpa [#allocation4], 0 }
   0x3   :  { %14 = vsyncpa [#allocation9], 0  ;;  %s579_s18 = smov [#allocation2]  }
   0x4   :  { %s20_s19 = sshll.u32 %s579_s18, 4  ;;  %s21_s19 = int_to_ptr.vmem [resolvable:$true] %s20_s19 }
   0x5   :  { %s499_s20 = scalar_lea.vmem %s21_s19, 1280  ;;  %p504_p1 = scmp.lt.s32.totalorder %s21_s19, %s21_s19 }
   0x6   :  { %p500_p0 = scmp.ne.s32.totalorder %s21_s19, %s499_s20  ;;  %p505_p2 = scmp.lt.s32.totalorder %s499_s20, %s499_s20 }
   0x8   :  { %p506_p3 = por %p505_p2, %p504_p1 }
   0xa   :  { %p507_p4 = pnand %p506_p3, %p500_p0 }
   0xc   :  { %510 = shalt.err (!%p507_p4)
}
   0xd   :  { %s580_s21 = smov 256   ;;  %s581_s22 = smov 16  }
   0xe   :  { %26 = dma.hbm_to_vmem [thread:$0]  %s690_s0, 1280, %s21_s19, [#allocation3], %s580_s21, %s580_s21, %s581_s22  }
   0xf   :  { %s582_s25 = smov [#allocation5]  }
  0x10   :  { %s32_s26 = sshll.u32 %s582_s25, 4  ;;  %s33_s26 = int_to_ptr.vmem [resolvable:$true] %s32_s26 }
  0x11   :  { %s519_s27 = scalar_lea.vmem %s33_s26, 128  ;;  %p524_p6 = scmp.lt.s32.totalorder %s33_s26, %s33_s26 }
  0x12   :  { %p520_p5 = scmp.ne.s32.totalorder %s33_s26, %s519_s27  ;;  %p525_p7 = scmp.lt.s32.totalorder %s519_s27, %s519_s27 }
  0x14   :  { %p526_p8 = por %p525_p7, %p524_p6 }
  0x16   :  { %p527_p9 = pnand %p526_p8, %p520_p5 }
  0x18   :  { %530 = shalt.err (!%p527_p9)
}
  0x19   :  { %s583_s28 = smov 64   ;;  %s584_s29 = smov 4  }
  0x1a   :  { %38 = dma.hbm_to_vmem [thread:$0]  %s691_s1, 128, %s33_s26, [#allocation6], %s583_s28, %s583_s28, %s584_s29  }
  0x1b   :  { %571 = dma.done.wait [#allocation3], 1280  }
  0x1c   :  { %572 = vsyncadd [#allocation3], 4294966016 }
  0x1d   :  { %573 = dma.done.wait [#allocation6], 128  }
  0x1e   :  { %574 = vsyncadd [#allocation6], 4294967168  ;;  %v585_v0 = vmov 0   ;;  %v54_v1 = vld [vmem:[#allocation2 + $0x40] sm:$0x33]  ;;  %vm117_vm0 = vcmask 1041408  }
  0x1f   :  { %162 = vmatprep.mubr.bf16.mxu0 %v585_v0  ;;  %205 = vmatprep.mubr.bf16.mxu1 %v585_v0  ;;  %v55_v2 = vld [vmem:[#allocation2 + $0x48] sm:$0x33]  ;;  %v50_v3 = vld [vmem:[#allocation2 + $0x20] sm:$0xff]  ;;  %v449_v4 = vcombine.high %v54_v1, %v54_v1  ;;  %v224_v5 = vunpack.c.l.bf16 %v54_v1  ;;  %v225_v6 = vunpack.c.h.bf16 %v54_v1  ;;  %v52_v8 = vld [vmem:[#allocation2 + $0x30] sm:$0xff]  ;;  %v448_v9 = vcombine.low %v54_v1, %v54_v1  ;;  %s587_s0 = smov [#allocation7]   ;;  %s588_s7 = smov [#allocation8]  }
  0x20   :  { %v451_v7 = vcombine.high %v55_v2, %v55_v2  ;;  %v450_v10 = vcombine.low %v55_v2, %v55_v2  ;;  %v51_v11 = vld [vmem:[#allocation2 + $0x28] sm:$0xff]  ;;  %v445_v14 = vcombine.high %v50_v3, %v52_v8  ;;  %v53_v15 = vld [vmem:[#allocation2 + $0x38] sm:$0xff]  ;;  %v220_v18 = vunpack.c.l.bf16 %v52_v8  ;;  %v484_v23 = vld [vmem:[#allocation2 + $0x4] ss:$16 sps:$4 sm:$0xff]   ;;  %s404_s1 = sshll.u32 %s587_s0, 4  ;;  %s417_s8 = sshll.u32 %s588_s7, 4  ;;  %s405_s1 = int_to_ptr.vmem [resolvable:$true] %s404_s1  ;;  %s418_s8 = int_to_ptr.vmem [resolvable:$true] %s417_s8 }
  0x21   :  { %452 = vmatprep.subr.msk.bf16.mxu0 %vm117_vm0, %v449_v4  ;;  %v248_v12 = vrot.slane %v224_v5, 4  ;;  %v249_v13 = vrot.slane %v225_v6, 4  ;;  %v119_v16 = vsel %vm117_vm0, %v448_v9, 0  ;;  %v221_v19 = vunpack.c.h.bf16 %v52_v8  ;;  %v486_v24 = vld [vmem:[#allocation2 + $0xc] ss:$16 sps:$4 sm:$0xff]   ;;  %s531_s9 = scalar_lea.vmem %s405_s1, 512  ;;  %p536_p11 = scmp.lt.s32.totalorder %s405_s1, %s405_s1 }
  0x22   :  { %454 = vmatprep.subr.msk.bf16.mxu1 %vm117_vm0, %v451_v7  ;;  %v125_v17 = vsel %vm117_vm0, %v450_v10, 0  ;;  %141 = vmatpush1.bf16.msra.mxu0 %v119_v16  ;;  %v447_v20 = vcombine.high %v51_v11, %v53_v15  ;;  %v444_v25 = vcombine.low %v50_v3, %v52_v8  ;;  %v446_v26 = vcombine.low %v51_v11, %v53_v15  ;;  %v488_v27 = vld [vmem:[#allocation2] ss:$16 sps:$4 sm:$0xff]   ;;  %v489_v28 = vld [vmem:[#allocation2 + $0x8] ss:$16 sps:$4 sm:$0xff]   ;;  %p532_p10 = scmp.ne.s32.totalorder %s405_s1, %s531_s9  ;;  %p537_p12 = scmp.lt.s32.totalorder %s531_s9, %s531_s9 }
  0x23   :  { %184 = vmatpush1.bf16.msra.mxu1 %v125_v17  ;;  %142 = vmatprep.subr.bf16.mxu0 %v445_v14  ;;  %v256_v21 = vmax.f32 %v220_v18, %v248_v12  ;;  %v257_v22 = vmax.f32 %v221_v19, %v249_v13  ;;  %v490_v29 = vld [vmem:[#allocation5] sm:$0x3f]   ;;  %vm113_vm1 = vcmask 293888   ;;  %v216_v30 = vunpack.c.l.bf16 %v50_v3 }
  0x24   :  { %185 = vmatprep.subr.bf16.mxu1 %v447_v20  ;;  %v217_v31 = vunpack.c.h.bf16 %v50_v3  ;;  %v226_v32 = vunpack.c.l.bf16 %v55_v2  ;;  %v227_v33 = vunpack.c.h.bf16 %v55_v2  ;;  %v218_v34 = vunpack.c.l.bf16 %v51_v11  ;;  %p538_p13 = por %p537_p12, %p536_p11 }
  0x25   :  { %v232_v35 = vrot.slane %v216_v30, 4  ;;  %v222_v38 = vunpack.c.l.bf16 %v53_v15  ;;  %v219_v40 = vunpack.c.h.bf16 %v51_v11  ;;  %v223_v41 = vunpack.c.h.bf16 %v53_v15 }
  0x26   :  { %143 = vmatpush1.bf16.msra.mxu0 %v444_v25  ;;  %v233_v36 = vrot.slane %v217_v31, 4  ;;  %v250_v37 = vrot.slane %v226_v32, 4  ;;  %v251_v39 = vrot.slane %v227_v33, 4  ;;  %v234_v42 = vrot.slane %v218_v34, 4  ;;  %p539_p0 = pnand %p538_p13, %p532_p10 }
  0x27   :  { %186 = vmatpush1.bf16.msra.mxu1 %v446_v26  ;;  %144 = vmatprep.subr.bf16.mxu0 %v484_v23  ;;  %v240_v43 = vmax.f32 %v216_v30, %v232_v35  ;;  %v264_v45 = vrot.slane %v256_v21, 4  ;;  %v265_v46 = vrot.slane %v257_v22, 4  ;;  %v235_v48 = vrot.slane %v219_v40, 4 }
  0x28   :  { %187 = vmatprep.subr.bf16.mxu1 %v486_v24  ;;  %v241_v44 = vmax.f32 %v217_v31, %v233_v36  ;;  %v258_v47 = vmax.f32 %v222_v38, %v250_v37  ;;  %v242_v49 = vmax.f32 %v218_v34, %v234_v42  ;;  %v259_v50 = vmax.f32 %v223_v41, %v251_v39 }
  0x29   :  { %v632_v52 = vmax.f32 %v240_v43, %v264_v45  ;;  %v243_v54 = vmax.f32 %v219_v40, %v235_v48  ;;  %vm281_vm2 = vcmask 1043456  }
  0x2a   :  { %145 = vmatpush1.bf16.msra.mxu0 %v488_v27  ;;  %v266_v51 = vrot.slane %v258_v47, 4  ;;  %v634_v53 = vmax.f32 %v241_v44, %v265_v46  ;;  %v267_v55 = vrot.slane %v259_v50, 4 }
  0x2b   :  { %188 = vmatpush1.bf16.msra.mxu1 %v489_v28  ;;  %v329_v57 = vmul.f32 %v632_v52, %v632_v52  ;;  %v320_v61 = vsel %vm281_vm2, %v632_v52, 0.0 }
  0x2c   :  { %v636_v56 = vmax.f32 %v242_v49, %v266_v51  ;;  %v330_v58 = vmul.f32 %v634_v53, %v634_v53  ;;  %v642_v59 = vmax.f32 %v243_v54, %v267_v55  ;;  %v321_v62 = vsel %vm281_vm2, %v634_v53, 0.0 }
  0x2d   :  { %453 = vmatmul.mubr.msk.bf16.vlgmr.msra.gmra.mxu0 %vm113_vm1, %v490_v29  ;;  %v333_v63 = vsel %vm281_vm2, %v329_v57, 0.0  ;;  %v322_v1 = vadd.f32 %v321_v62, %v320_v61  ;;  %v586_v54 = vmov 1983009808   ;;  %v385_v57 = vlaneseq }
  0x2e   :  { %455 = vmatmul.mubr.msk.bf16.vlgmr.msra.gmra.mxu1 %vm113_vm1, %v490_v29  ;;  %v331_v60 = vmul.f32 %v636_v56, %v636_v56  ;;  %v334_v0 = vsel %vm281_vm2, %v330_v58, 0.0  ;;  %v332_v2 = vmul.f32 %v642_v59, %v642_v59  ;;  %v323_v5 = vsel %vm281_vm2, %v636_v56, 0.0 }
  0x2f   :  { %v335_v3 = vadd.f32 %v334_v0, %v333_v63  ;;  %v324_v6 = vadd.f32 %v323_v5, %v322_v1  ;;  %v325_v9 = vsel %vm281_vm2, %v642_v59, 0.0  ;;  %v383_v55 = vunpack.c.l.s4 %v586_v54 }
  0x30   :  { %v336_v4 = vsel %vm281_vm2, %v331_v60, 0.0  ;;  %v338_v8 = vsel %vm281_vm2, %v332_v2, 0.0  ;;  %v386_v60 = vshrl.u32 %v385_v57, 7  ;;  %v460_v61 = vpack.c.bf16 %v634_v53, %v632_v52 }
  0x31   :  { %v337_v7 = vadd.f32 %v336_v4, %v335_v3  ;;  %v326_v10 = vadd.f32 %v325_v9, %v324_v6  ;;  %v384_v58 = vunpack.c.0.s8 %v383_v55  ;;  %v461_v62 = vpack.c.bf16 %v642_v59, %v636_v56 }
  0x33   :  { %v339_v11 = vadd.f32 %v338_v8, %v337_v7  ;;  %v387_v63 = vsub.s32 %v384_v58, %v386_v60 }
  0x35   :  { %v388_v0 = vrot.slane %v460_v61, %v387_v63  ;;  %v395_v1 = vrot.slane %v461_v62, %v387_v63 }
  0x37   :  { %v396_v2 = vcombine.low %v388_v0, %v395_v1 }
  0x39   :  { %398 = vst [vmem:[#allocation8] sm:$0xff] %v396_v2 }
  0xed   :  { %v164_v12 = vpop.f32.mrf.mxu0 }
  0xee   :  { %v207_v13 = vpop.f32.mrf.mxu1  ;;  %v291_v20 = vmul.f32 %v164_v12, %v164_v12 }
  0xef   :  { %v166_v14 = vpop.f32.mrf.mxu0  ;;  %v293_v23 = vmul.f32 %v207_v13, %v207_v13 }
  0xf0   :  { %v209_v15 = vpop.f32.mrf.mxu1  ;;  %v276_v16 = vadd.f32 %v166_v14, %v164_v12  ;;  %v292_v17 = vmul.f32 %v166_v14, %v166_v14  ;;  %v462_v18 = vpack.c.bf16 %v166_v14, %v164_v12 }
  0xf1   :  { %v463_v19 = vpack.c.bf16 %v209_v15, %v207_v13  ;;  %v168_v21 = vpop.f32.mrf.mxu0  ;;  %v294_v29 = vmul.f32 %v209_v15, %v209_v15 }
  0xf2   :  { %v211_v22 = vpop.f32.mrf.mxu1  ;;  %368 = vst [vmem:[#allocation7] sm:$0xff] %v462_v18  ;;  %v295_v24 = vmul.f32 %v168_v21, %v168_v21  ;;  %v282_v25 = vsel %vm281_vm2, %v168_v21, 0.0  ;;  %v277_v28 = vadd.f32 %v276_v16, %v207_v13  ;;  %v299_v30 = vadd.f32 %v292_v17, %v291_v20 }
  0xf3   :  { %369 = vst [vmem:[#allocation7 + $0x8] sm:$0xff] %v463_v19  ;;  %v170_v26 = vpop.f32.mrf.mxu0  ;;  %v297_v31 = vmul.f32 %v211_v22, %v211_v22  ;;  %v285_v36 = vsel %vm281_vm2, %v211_v22, 0.0 }
  0xf4   :  { %v213_v27 = vpop.f32.mrf.mxu1  ;;  %v283_v32 = vsel %vm281_vm2, %v170_v26, 0.0  ;;  %v296_v33 = vmul.f32 %v170_v26, %v170_v26  ;;  %v464_v34 = vpack.c.bf16 %v170_v26, %v168_v21  ;;  %v304_v35 = vsel %vm281_vm2, %v295_v24, 0.0 }
  0xf5   :  { %v284_v37 = vadd.f32 %v283_v32, %v282_v25  ;;  %v465_v38 = vpack.c.bf16 %v213_v27, %v211_v22  ;;  %v298_v40 = vmul.f32 %v213_v27, %v213_v27  ;;  %v278_v41 = vadd.f32 %v277_v28, %v209_v15 }
  0xf6   :  { %v305_v39 = vsel %vm281_vm2, %v296_v33, 0.0  ;;  %370 = vst [vmem:[#allocation7 + $0x10] sm:$0x33] %v464_v34  ;;  %v300_v42 = vadd.f32 %v299_v30, %v293_v23  ;;  %v287_v45 = vsel %vm281_vm2, %v213_v27, 0.0  ;;  %v307_v47 = vsel %vm281_vm2, %v297_v31, 0.0 }
  0xf7   :  { %v306_v43 = vadd.f32 %v305_v39, %v304_v35  ;;  %371 = vst [vmem:[#allocation7 + $0x18] sm:$0x33] %v465_v38  ;;  %v286_v44 = vadd.f32 %v285_v36, %v284_v37  ;;  %279 = vadd.xlane.f32.xlu0 %v278_v41  ;;  %v309_v50 = vsel %vm281_vm2, %v298_v40, 0.0 }
  0xf8   :  { %v301_v46 = vadd.f32 %v300_v42, %v294_v29 }
  0xf9   :  { %v288_v48 = vadd.f32 %v287_v45, %v286_v44  ;;  %v308_v49 = vadd.f32 %v307_v47, %v306_v43 }
  0xfa   :  { %302 = vadd.xlane.f32.xlu1 %v301_v46 }
  0xfb   :  { %v310_v51 = vadd.f32 %v309_v50, %v308_v49  ;;  %289 = vadd.xlane.f32.xlu0 %v288_v48 }
  0xfe   :  { %311 = vadd.xlane.f32.xlu1 %v310_v51 }
  0xff   :  { %327 = vadd.xlane.f32.xlu0 %v326_v10 }
 0x102   :  { %340 = vadd.xlane.f32.xlu1 %v339_v11 }
 0x103   :  { %542 = shalt.err (!%p539_p0)
}
 0x104   :  { %410 = dma.vmem_to_hbm [thread:$0]  %s405_s1, 512, %s692_s2, [#allocation4], %s580_s21, %s580_s21, %s581_s22  }
 0x105   :  { %s551_s12 = scalar_lea.vmem %s418_s8, 128  ;;  %p556_p2 = scmp.lt.s32.totalorder %s418_s8, %s418_s8 }
 0x106   :  { %p552_p1 = scmp.ne.s32.totalorder %s418_s8, %s551_s12  ;;  %p557_p3 = scmp.lt.s32.totalorder %s551_s12, %s551_s12 }
 0x108   :  { %p558_p4 = por %p557_p3, %p556_p2 }
 0x10a   :  { %p559_p5 = pnand %p558_p4, %p552_p1 }
 0x10c   :  { %562 = shalt.err (!%p559_p5)
}
 0x10d   :  { %420 = dma.vmem_to_hbm [thread:$0]  %s418_s8, 128, %s693_s3, [#allocation9]   ;;  %vm313_vm3 = vcmask 7168   ;;  %vm316_vm4 = vcmask 15360   ;;  %vm318_vm5 = vcmask 11264  }
 0x180   :  { %v280_v52 = vpop.xlane.xlu0 %279 }
 0x183   :  { %v303_v53 = vpop.xlane.xlu1 %302 }
 0x184   :  { %v314_v56 = vsel %vm313_vm3, %v280_v52, %v303_v53  ;;  %v290_v59 = vpop.xlane.xlu0 %289 }
 0x185   :  { %317 = vst.msk [vmem:[%s694_s4] sm:$0xff] %vm316_vm4, %v314_v56 }
 0x187   :  { %v312_v3 = vpop.xlane.xlu1 %311 }
 0x188   :  { %v315_v4 = vsel %vm313_vm3, %v290_v59, %v312_v3  ;;  %v328_v5 = vpop.xlane.xlu0 %327 }
 0x189   :  { %319 = vst.msk [vmem:[%s694_s4 + $0x8] sm:$0xf] %vm318_vm5, %v315_v4 }
 0x18b   :  { %v341_v6 = vpop.xlane.xlu1 %340 }
 0x18c   :  { %v342_v7 = vsel %vm313_vm3, %v328_v5, %v341_v6 }
 0x18d   :  { %343 = vst.msk [vmem:[%s695_s5] sm:$0xf] %vm318_vm5, %v342_v7 }
 0x18e   :  { %575 = dma.done.wait [#allocation4], 512  }
 0x18f   :  { %576 = vsyncadd [#allocation4], 4294966784 }
 0x190   :  { %577 = dma.done.wait [#allocation9], 128  }
 0x191   :  { %578 = vsyncadd [#allocation9], 4294967168 }
 0x192   :  { %435 = vsyncpa [#allocation3], 1 }
 0x193   :  { %436 = vsyncpa [#allocation6], 1 }
 0x194   :  { %437 = vsyncpa [#allocation4], 1 }
 0x195   :  { %438 = vsyncpa [#allocation9], 1 }

</bundles_post_ra>
